<compile_context>
chip_gen: v5e
topology: v5e:2x2
jax: 0.10.0
libtpu: 0.0.40
codegen_flags: <defaults>
</compile_context>

<pallas_src>
import jax
import jax.numpy as jnp
from jax.experimental import pallas as pl
from jax.experimental.pallas import tpu as pltpu


H1, H2 = 400, 300        # logical hidden sizes from the PyTorch module
H1P, H2P = 512, 384      # lane-padded hidden sizes (minimal multiples of 128)


def _round_up(x: int, m: int) -> int:
    return ((x + m - 1) // m) * m


def critic_kernel(state_ref, w1_ref, b1_ref, w2_ref, b2_ref, w3_ref, b3_ref,
                  out_ref):
    # In-kernel bf16 cast of the f32 state (VPU filler under the MXU).
    x = state_ref[...].astype(jnp.bfloat16)

    # l1: relu(state @ W1 + b1)   -> (Bt, H1P), f32 accumulation on the MXU.
    h1 = jnp.dot(x, w1_ref[...],
                 preferred_element_type=jnp.float32) + b1_ref[...]
    h1 = jnp.maximum(h1, 0.0).astype(jnp.bfloat16)

    # l2: relu(h1 @ W2 + b2)      -> (Bt, H2P)
    h2 = jnp.dot(h1, w2_ref[...],
                 preferred_element_type=jnp.float32) + b2_ref[...]
    h2 = jnp.maximum(h2, 0.0).astype(jnp.bfloat16)

    # l3: h2 @ W3 + b3            -> (Bt, NAP); only the real nb_actions columns
    # are stored to HBM (padded columns never leave VMEM).
    q = jnp.dot(h2, w3_ref[...],
                preferred_element_type=jnp.float32) + b3_ref[...]
    out_ref[...] = q[:, :out_ref.shape[1]].astype(out_ref.dtype)


def critic_dql_forward(state, params, nb_actions, *, block_b=1024):
    """Fused forward. state: (B, state_space) float32 -> (B, nb_actions) float32."""
    B, S = state.shape

    # Padding-aware batch tiling: pick the number of tiles first, then size the
    # tile to just cover B (rounded to 16 rows for bf16 sublane packing).
    n_tiles = pl.cdiv(B, block_b)
    if B >= 512:
        # Even grid of >= 2 so the batch axis can split across v7x's two
        # TensorCores; skipped for small batches (single-TC overhead would grow).
        n_tiles = _round_up(max(n_tiles, 2), 2)
    bt = _round_up(pl.cdiv(B, n_tiles), 16)
    b_pad = n_tiles * bt

    if b_pad != B:
        state = jnp.pad(state, ((0, b_pad - B), (0, 0)))

    resident = lambda i: (0, 0)     # weights/biases: same block every grid step
    tiled = lambda i: (i, 0)        # activations: walk the batch

    nap = params["w3"].shape[1]     # 128-padded N for the MXU
    flops = 2 * b_pad * (S * H1P + H1P * H2P + H2P * nap)
    param_bytes = sum(int(p.size) * p.dtype.itemsize for p in params.values())
    bytes_accessed = b_pad * S * 4 + b_pad * nb_actions * 4 + param_bytes

    out = pl.pallas_call(
        critic_kernel,
        out_shape=jax.ShapeDtypeStruct((b_pad, nb_actions), jnp.float32),
        grid=(n_tiles,),
        in_specs=[
            pl.BlockSpec((bt, S), tiled),
            pl.BlockSpec(params["w1"].shape, resident),
            pl.BlockSpec(params["b1"].shape, resident),
            pl.BlockSpec(params["w2"].shape, resident),
            pl.BlockSpec(params["b2"].shape, resident),
            pl.BlockSpec(params["w3"].shape, resident),
            pl.BlockSpec(params["b3"].shape, resident),
        ],
        out_specs=pl.BlockSpec((bt, nb_actions), tiled),
        compiler_params=pltpu.CompilerParams(
            dimension_semantics=("parallel",)),
        cost_estimate=pl.CostEstimate(
            flops=int(flops), transcendentals=0,
            bytes_accessed=int(bytes_accessed)),
    )(state, params["w1"], params["b1"], params["w2"], params["b2"],
      params["w3"], params["b3"])

    return out[:B]


def init_params(key, state_space, nb_actions):
    """PyTorch-default Linear init (U(-1/sqrt(fan_in), 1/sqrt(fan_in)));
    l3 overridden with U(-0.003, 0.003). Weights stored bf16, zero-padded to
    lane-friendly shapes; biases stored f32 (added after f32 accumulation)."""
    nap = _round_up(nb_actions, 128)
    ks = jax.random.split(key, 6)

    def unif(k, shape, bound):
        return jax.random.uniform(k, shape, jnp.float32, -bound, bound)

    bnd1 = 1.0 / float(jnp.sqrt(float(state_space)))
    bnd2 = 1.0 / float(jnp.sqrt(400.0))
    bnd3 = 3 * 0.001

    w1 = unif(ks[0], (state_space, H1), bnd1)
    b1 = unif(ks[1], (1, H1), bnd1)
    w2 = unif(ks[2], (H1, H2), bnd2)
    b2 = unif(ks[3], (1, H2), bnd2)
    w3 = unif(ks[4], (H2, nb_actions), bnd3)
    b3 = unif(ks[5], (1, nb_actions), bnd3)

    # Zero padding is inert: padded W1 cols / b1 cols stay 0 through ReLU, and the
    # corresponding padded W2/W3 rows are 0, so padding never reaches the output.
    pad = lambda a, r, c: jnp.pad(a, ((0, r - a.shape[0]), (0, c - a.shape[1])))
    return {
        "w1": pad(w1, state_space, H1P).astype(jnp.bfloat16),
        "b1": pad(b1, 1, H1P),
        "w2": pad(w2, H1P, H2P).astype(jnp.bfloat16),
        "b2": pad(b2, 1, H2P),
        "w3": pad(w3, H2P, nap).astype(jnp.bfloat16),
        "b3": pad(b3, 1, nap),
    }


def reference_forward(state, params, nb_actions):
    """Pure-JAX reference with identical bf16-weight / f32-accumulate numerics."""
    x = state.astype(jnp.bfloat16)
    h1 = jnp.maximum(jnp.dot(x, params["w1"], preferred_element_type=jnp.float32)
                     + params["b1"], 0.0).astype(jnp.bfloat16)
    h2 = jnp.maximum(jnp.dot(h1, params["w2"], preferred_element_type=jnp.float32)
                     + params["b2"], 0.0).astype(jnp.bfloat16)
    q = jnp.dot(h2, params["w3"], preferred_element_type=jnp.float32) + params["b3"]
    return q[:, :nb_actions]


if __name__ == "__main__":
    batch = 2
    state_space = 8
    nb_actions = 4

    key = jax.random.PRNGKey(0)
    k_state, k_params = jax.random.split(key)

    state = jax.random.normal(k_state, (batch, state_space), jnp.float32)
    params = init_params(k_params, state_space, nb_actions)

    out = critic_dql_forward(state, params, nb_actions)
    out = jax.block_until_ready(out)

    ref = reference_forward(state, params, nb_actions)
    assert out.shape == (batch, nb_actions), out.shape
    assert jnp.allclose(out, ref, atol=2e-3, rtol=2e-3), (out, ref)

    # Also exercise a larger batch that triggers the even, multi-tile grid path.
    big_b = 600
    big_state = jax.random.normal(jax.random.PRNGKey(1), (big_b, state_space),
                                  jnp.float32)
    big_out = jax.block_until_ready(
        critic_dql_forward(big_state, params, nb_actions))
    big_ref = reference_forward(big_state, params, nb_actions)
    assert big_out.shape == (big_b, nb_actions), big_out.shape
    assert jnp.allclose(big_out, big_ref, atol=2e-3, rtol=2e-3)

    print("KERNEL_OK")
</pallas_src>

<mosaic_0001>
module attributes {stable_mosaic.version = 11 : i64} {
  func.func @critic_kernel(%arg0: i32, %arg1: memref<16x8xf32, #tpu.memory_space<vmem>>, %arg2: memref<8x512xbf16, #tpu.memory_space<vmem>>, %arg3: memref<1x512xf32, #tpu.memory_space<vmem>>, %arg4: memref<512x384xbf16, #tpu.memory_space<vmem>>, %arg5: memref<1x384xf32, #tpu.memory_space<vmem>>, %arg6: memref<384x128xbf16, #tpu.memory_space<vmem>>, %arg7: memref<1x128xf32, #tpu.memory_space<vmem>>, %arg8: memref<16x4xf32, #tpu.memory_space<vmem>>) attributes {dimension_semantics = [#tpu.dimension_semantics<parallel>], iteration_bounds = array<i64: 1>, scalar_prefetch = 0 : i64, scratch_operands = 0 : i64, tpu.core_type = #tpu.core_type<tc>, window_params = [{transform_indices = @transform_0, window_bounds = array<i64: 16, 8>}, {pipeline_mode = #tpu.pipeline_mode<synchronous>, transform_indices = @transform_1, window_bounds = array<i64: 8, 512>}, {pipeline_mode = #tpu.pipeline_mode<synchronous>, transform_indices = @transform_2, window_bounds = array<i64: 1, 512>}, {pipeline_mode = #tpu.pipeline_mode<synchronous>, transform_indices = @transform_3, window_bounds = array<i64: 512, 384>}, {pipeline_mode = #tpu.pipeline_mode<synchronous>, transform_indices = @transform_4, window_bounds = array<i64: 1, 384>}, {pipeline_mode = #tpu.pipeline_mode<synchronous>, transform_indices = @transform_5, window_bounds = array<i64: 384, 128>}, {pipeline_mode = #tpu.pipeline_mode<synchronous>, transform_indices = @transform_6, window_bounds = array<i64: 1, 128>}, {transform_indices = @transform_7, window_bounds = array<i64: 16, 4>}]} {
    %c0 = arith.constant 0 : index
    %c0_0 = arith.constant 0 : index
    %0 = vector.load %arg1[%c0, %c0_0] : memref<16x8xf32, #tpu.memory_space<vmem>>, vector<16x8xf32>
    %1 = arith.truncf %0 : vector<16x8xf32> to vector<16x8xbf16>
    %c0_1 = arith.constant 0 : index
    %c0_2 = arith.constant 0 : index
    %2 = vector.load %arg2[%c0_1, %c0_2] : memref<8x512xbf16, #tpu.memory_space<vmem>>, vector<8x512xbf16>
    %cst = arith.constant dense<0.000000e+00> : vector<16x512xf32>
    %3 = tpu.matmul %1, %2, %cst {dimension_numbers = #tpu.dot_dimension_numbers<[1], [0], [0], [1], [0, 0, 1, 1], [], []>} : vector<16x8xbf16>, vector<8x512xbf16>, vector<16x512xf32> -> vector<16x512xf32>
    %c0_3 = arith.constant 0 : index
    %c0_4 = arith.constant 0 : index
    %4 = vector.load %arg3[%c0_3, %c0_4] : memref<1x512xf32, #tpu.memory_space<vmem>>, vector<1x512xf32>
    %5 = vector.broadcast %4 : vector<1x512xf32> to vector<16x512xf32>
    %6 = arith.addf %3, %5 : vector<16x512xf32>
    %cst_5 = arith.constant 0.000000e+00 : f32
    %7 = vector.broadcast %cst_5 : f32 to vector<16x512xf32>
    %8 = arith.maximumf %6, %7 : vector<16x512xf32>
    %9 = arith.truncf %8 : vector<16x512xf32> to vector<16x512xbf16>
    %c0_6 = arith.constant 0 : index
    %c0_7 = arith.constant 0 : index
    %10 = vector.load %arg4[%c0_6, %c0_7] : memref<512x384xbf16, #tpu.memory_space<vmem>>, vector<512x384xbf16>
    %cst_8 = arith.constant dense<0.000000e+00> : vector<16x384xf32>
    %11 = tpu.matmul %9, %10, %cst_8 {dimension_numbers = #tpu.dot_dimension_numbers<[1], [0], [0], [1], [0, 0, 1, 1], [], []>} : vector<16x512xbf16>, vector<512x384xbf16>, vector<16x384xf32> -> vector<16x384xf32>
    %c0_9 = arith.constant 0 : index
    %c0_10 = arith.constant 0 : index
    %12 = vector.load %arg5[%c0_9, %c0_10] : memref<1x384xf32, #tpu.memory_space<vmem>>, vector<1x384xf32>
    %13 = vector.broadcast %12 : vector<1x384xf32> to vector<16x384xf32>
    %14 = arith.addf %11, %13 : vector<16x384xf32>
    %cst_11 = arith.constant 0.000000e+00 : f32
    %15 = vector.broadcast %cst_11 : f32 to vector<16x384xf32>
    %16 = arith.maximumf %14, %15 : vector<16x384xf32>
    %17 = arith.truncf %16 : vector<16x384xf32> to vector<16x384xbf16>
    %c0_12 = arith.constant 0 : index
    %c0_13 = arith.constant 0 : index
    %18 = vector.load %arg6[%c0_12, %c0_13] : memref<384x128xbf16, #tpu.memory_space<vmem>>, vector<384x128xbf16>
    %cst_14 = arith.constant dense<0.000000e+00> : vector<16x128xf32>
    %19 = tpu.matmul %17, %18, %cst_14 {dimension_numbers = #tpu.dot_dimension_numbers<[1], [0], [0], [1], [0, 0, 1, 1], [], []>} : vector<16x384xbf16>, vector<384x128xbf16>, vector<16x128xf32> -> vector<16x128xf32>
    %c0_15 = arith.constant 0 : index
    %c0_16 = arith.constant 0 : index
    %20 = vector.load %arg7[%c0_15, %c0_16] : memref<1x128xf32, #tpu.memory_space<vmem>>, vector<1x128xf32>
    %21 = vector.broadcast %20 : vector<1x128xf32> to vector<16x128xf32>
    %22 = arith.addf %19, %21 : vector<16x128xf32>
    %23 = vector.extract_strided_slice %22 {offsets = [0, 0], sizes = [16, 4], strides = [1, 1]} : vector<16x128xf32> to vector<16x4xf32>
    %c0_17 = arith.constant 0 : index
    %c0_18 = arith.constant 0 : index
    %24 = vector.load %arg8[%c0_17, %c0_18] : memref<16x4xf32, #tpu.memory_space<vmem>>, vector<16x4xf32>
    tpu.vector_store %arg8[%c0_17, %c0_18], %23 {strides = array<i32>} : memref<16x4xf32, #tpu.memory_space<vmem>>, vector<16x4xf32>,
    return
  }
  func.func @transform_0(%arg0: i32) -> (i32, i32) {
    %c0_i32 = arith.constant 0 : i32
    %c0_i32_0 = arith.constant 0 : i32
    return %arg0, %c0_i32 : i32, i32
  }
  func.func @transform_1(%arg0: i32) -> (i32, i32) {
    %c0_i32 = arith.constant 0 : i32
    %c0_i32_0 = arith.constant 0 : i32
    %c0_i32_1 = arith.constant 0 : i32
    return %c0_i32, %c0_i32_0 : i32, i32
  }
  func.func @transform_2(%arg0: i32) -> (i32, i32) {
    %c0_i32 = arith.constant 0 : i32
    %c0_i32_0 = arith.constant 0 : i32
    %c0_i32_1 = arith.constant 0 : i32
    return %c0_i32, %c0_i32_0 : i32, i32
  }
  func.func @transform_3(%arg0: i32) -> (i32, i32) {
    %c0_i32 = arith.constant 0 : i32
    %c0_i32_0 = arith.constant 0 : i32
    %c0_i32_1 = arith.constant 0 : i32
    return %c0_i32, %c0_i32_0 : i32, i32
  }
  func.func @transform_4(%arg0: i32) -> (i32, i32) {
    %c0_i32 = arith.constant 0 : i32
    %c0_i32_0 = arith.constant 0 : i32
    %c0_i32_1 = arith.constant 0 : i32
    return %c0_i32, %c0_i32_0 : i32, i32
  }
  func.func @transform_5(%arg0: i32) -> (i32, i32) {
    %c0_i32 = arith.constant 0 : i32
    %c0_i32_0 = arith.constant 0 : i32
    %c0_i32_1 = arith.constant 0 : i32
    return %c0_i32, %c0_i32_0 : i32, i32
  }
  func.func @transform_6(%arg0: i32) -> (i32, i32) {
    %c0_i32 = arith.constant 0 : i32
    %c0_i32_0 = arith.constant 0 : i32
    %c0_i32_1 = arith.constant 0 : i32
    return %c0_i32, %c0_i32_0 : i32, i32
  }
  func.func @transform_7(%arg0: i32) -> (i32, i32) {
    %c0_i32 = arith.constant 0 : i32
    %c0_i32_0 = arith.constant 0 : i32
    return %arg0, %c0_i32 : i32, i32
  }
}

</mosaic_0001>

<bundles_post_ra>
// kernel: tpu_custom_call.1
= control target key start
LH: loop header
LB: loop body
LE: loop exit
PB: predicated region body
PF: predicated region fallthrough
CT: control target
= control target key end

     0   :  { %12 = vsyncpa [#allocation3], 0  ;;  %s2023_s0 = inlined_call_operand.vmem [shape: f32[16,8], index: 0, kind: input, shape index: {}]   ;;  %s2024_s1 = inlined_call_operand.vmem [shape: bf16[8,512], index: 1, kind: input, shape index: {}]   ;;  %s2025_s2 = inlined_call_operand.vmem [shape: f32[1,512], index: 2, kind: input, shape index: {}]   ;;  %s2026_s3 = inlined_call_operand.hbm [shape: bf16[512,384], index: 3, kind: input, shape index: {}]   ;;  %s2027_s4 = inlined_call_operand.vmem [shape: f32[1,384], index: 4, kind: input, shape index: {}]   ;;  %s2028_s5 = inlined_call_operand.hbm [shape: bf16[384,128], index: 5, kind: input, shape index: {}]   ;;  %s2029_s6 = inlined_call_operand.vmem [shape: f32[1,128], index: 6, kind: input, shape index: {}]   ;;  %s2030_s7 = inlined_call_operand.vmem [shape: f32[16,4], index: 7, kind: output, shape index: {}]  }
   0x1   :  { %s24_s26 = sshll.u32 %s2026_s3, 4  ;;  %s25_s26 = int_to_ptr.hbm [resolvable:$true] %s24_s26 }
   0x2   :  { %13 = vsyncpa [#allocation5], 0  ;;  %s1904_s27 = smov [#allocation2]   ;;  %s39_s8 = sshll.u32 %s2028_s5, 4  ;;  %s40_s8 = int_to_ptr.hbm [resolvable:$true] %s39_s8 }
   0x3   :  { %s26_s28 = sshll.u32 %s1904_s27, 4  ;;  %s1905_s9 = smov 192   ;;  %s27_s28 = int_to_ptr.vmem [resolvable:$true] %s26_s28 }
   0x4   :  { %s1906_s10 = smov 12   ;;  %s1907_s11 = smov [#allocation4]  }
   0x5   :  { %32 = dma.hbm_to_vmem [thread:$0]  %s25_s26, 12288, %s27_s28, [#allocation3], %s1905_s9, %s1905_s9, %s1906_s10  }
   0x6   :  { %s41_s12 = sshll.u32 %s1907_s11, 4  ;;  %s1908_s13 = smov 64   ;;  %s42_s12 = int_to_ptr.vmem [resolvable:$true] %s41_s12 }
   0x7   :  { %s1909_s14 = smov 4  }
   0x8   :  { %47 = dma.hbm_to_vmem [thread:$0]  %s40_s8, 3072, %s42_s12, [#allocation5], %s1908_s13, %s1908_s13, %s1909_s14  }
   0x9   :  { %1900 = dma.done.wait [#allocation3], 12288  }
   0xa   :  { %1901 = vsyncadd [#allocation3], 4294955008 }
   0xb   :  { %1902 = dma.done.wait [#allocation5], 3072  }
   0xc   :  { %1903 = vsyncadd [#allocation5], 4294964224  ;;  %v62_v0 = vld [vmem:[%s2024_s1] sm:$0xff]  ;;  %v63_v1 = vld [vmem:[%s2024_s1 + $0x8] sm:$0xff]  ;;  %vm88_vm0 = vcmask 1043456   ;;  %vm84_vm1 = vcmask 64512  }
   0xd   :  { %v59_v2 = vld [vmem:[%s2023_s0] sm:$0xff]  ;;  %v76_v3 = vunpack.c.l.b16 %v62_v0  ;;  %v77_v4 = vunpack.c.h.b16 %v62_v0  ;;  %v78_v5 = vunpack.c.l.b16 %v63_v1  ;;  %v60_v6 = vld [vmem:[%s2023_s0 + $0x8] sm:$0xff]  ;;  %v79_v7 = vunpack.c.h.b16 %v63_v1  ;;  %v1771_v9 = vld [vmem:[#allocation2 + $0x170] sm:$0xf0] }
   0xe   :  { %v1427_v8 = vld [vmem:[#allocation2 + $0x168] sm:$0xf]  ;;  %v1415_v15 = vld [vmem:[#allocation2 + $0x150] sm:$0xf]  ;;  %v1768_v16 = vld [vmem:[#allocation2 + $0x158] sm:$0xf0]  ;;  %v1968_v18 = vpack.c.bf16 %v60_v6, %v59_v2 }
   0xf   :  { %v1331_v10 = vld [vmem:[#allocation2 + $0xa8] sm:$0xf]  ;;  %v80_v11 = vpack.c.b16 %v76_v3, %v76_v3  ;;  %v81_v12 = vpack.c.b16 %v77_v4, %v77_v4  ;;  %v82_v13 = vpack.c.b16 %v78_v5, %v78_v5  ;;  %v83_v14 = vpack.c.b16 %v79_v7, %v79_v7  ;;  %v1747_v17 = vld [vmem:[#allocation2 + $0xb0] sm:$0xf0]  ;;  %v1319_v23 = vld [vmem:[#allocation2 + $0x90] sm:$0xf] }
  0x10   :  { %v1428_v19 = vor.u32 %v1771_v9, %v1427_v8  ;;  %v1332_v20 = vor.u32 %v1747_v17, %v1331_v10  ;;  %v1523_v21 = vld [vmem:[#allocation2 + $0x228] sm:$0xf]  ;;  %v1795_v22 = vld [vmem:[#allocation2 + $0x230] sm:$0xf0]  ;;  %v1744_v28 = vld [vmem:[#allocation2 + $0x98] sm:$0xf0]  ;;  %v1416_v30 = vor.u32 %v1768_v16, %v1415_v15 }
  0x11   :  { %v90_v24 = vsel %vm88_vm0, %v80_v11, 0  ;;  %v93_v25 = vsel %vm88_vm0, %v81_v12, 0  ;;  %v96_v26 = vsel %vm88_vm0, %v82_v13, 0  ;;  %v99_v27 = vsel %vm88_vm0, %v83_v14, 0  ;;  %v1403_v31 = vld [vmem:[#allocation2 + $0x138] sm:$0xf] }
  0x12   :  { %108 = vmatpush.bf16.msra.mxu3 %v90_v24  ;;  %122 = vmatpush.bf16.msra.mxu1 %v93_v25  ;;  %v1524_v29 = vor.u32 %v1795_v22, %v1523_v21  ;;  %v1320_v32 = vor.u32 %v1744_v28, %v1319_v23  ;;  %v1511_v33 = vld [vmem:[#allocation2 + $0x210] sm:$0xf]  ;;  %v1792_v34 = vld [vmem:[#allocation2 + $0x218] sm:$0xf0]  ;;  %v1765_v35 = vld [vmem:[#allocation2 + $0x140] sm:$0xf0] }
  0x13   :  { %136 = vmatpush.bf16.msra.mxu2 %v96_v26  ;;  %817 = vmatpush.bf16.msra.mxu0 %v1332_v20  ;;  %v1307_v36 = vld [vmem:[#allocation2 + $0x78] sm:$0xf]  ;;  %v1741_v37 = vld [vmem:[#allocation2 + $0x80] sm:$0xf0]  ;;  %v1512_v38 = vor.u32 %v1792_v34, %v1511_v33  ;;  %v1391_v39 = vld [vmem:[#allocation2 + $0x120] sm:$0xf]  ;;  %v1404_v41 = vor.u32 %v1765_v35, %v1403_v31 }
  0x14   :  { %v1762_v40 = vld [vmem:[#allocation2 + $0x128] sm:$0xf0]  ;;  %v1308_v42 = vor.u32 %v1741_v37, %v1307_v36  ;;  %v1499_v43 = vld [vmem:[#allocation2 + $0x1f8] sm:$0xf]  ;;  %v1789_v44 = vld [vmem:[#allocation2 + $0x200] sm:$0xf0] }
  0x15   :  { %1241 = vmatmul.msk.bf16.vlgmr.msra.gmra.mxu3 %vm84_vm1, %v1968_v18  ;;  %1242 = vmatmul.msk.bf16.vlgmr.msra.gmra.mxu1 %vm84_vm1, %v1968_v18  ;;  %v1619_v45 = vld [vmem:[#allocation2 + $0x2e8] sm:$0xf]  ;;  %v1295_v46 = vld [vmem:[#allocation2 + $0x60] sm:$0xf]  ;;  %v1738_v47 = vld [vmem:[#allocation2 + $0x68] sm:$0xf0]  ;;  %v1500_v50 = vor.u32 %v1789_v44, %v1499_v43  ;;  %v1392_v53 = vor.u32 %v1762_v40, %v1391_v39 }
  0x16   :  { %150 = vmatpush.bf16.msrb.mxu3 %v99_v27  ;;  %831 = vmatpush.bf16.msrb.mxu1 %v1428_v19  ;;  %v1819_v48 = vld [vmem:[#allocation2 + $0x2f0] sm:$0xf0]  ;;  %v1607_v51 = vld [vmem:[#allocation2 + $0x2d0] sm:$0xf]  ;;  %v1816_v52 = vld [vmem:[#allocation2 + $0x2d8] sm:$0xf0]  ;;  %v1296_v55 = vor.u32 %v1738_v47, %v1295_v46 }
  0x17   :  { %1243 = vmatmul.msk.bf16.vlgmr.msra.gmra.mxu2 %vm84_vm1, %v1968_v18  ;;  %818 = vmatpush.bf16.msra.mxu0 %v1320_v32  ;;  %v1620_v49 = vor.u32 %v1819_v48, %v1619_v45  ;;  %v1379_v54 = vld [vmem:[#allocation2 + $0x108] sm:$0xf]  ;;  %v1487_v56 = vld [vmem:[#allocation2 + $0x1e0] sm:$0xf]  ;;  %v1786_v57 = vld [vmem:[#allocation2 + $0x1e8] sm:$0xf0]  ;;  %v1608_v61 = vor.u32 %v1816_v52, %v1607_v51 }
  0x18   :  { %845 = vmatpush.bf16.msrb.mxu2 %v1524_v29  ;;  %v1759_v58 = vld [vmem:[#allocation2 + $0x110] sm:$0xf0]  ;;  %v1283_v59 = vld [vmem:[#allocation2 + $0x48] sm:$0xf]  ;;  %v1488_v62 = vor.u32 %v1786_v57, %v1487_v56  ;;  %v1595_v63 = vld [vmem:[#allocation2 + $0x2b8] sm:$0xf] }
  0x19   :  { %v1735_v60 = vld [vmem:[#allocation2 + $0x50] sm:$0xf0]  ;;  %v1813_v0 = vld [vmem:[#allocation2 + $0x2c0] sm:$0xf0]  ;;  %v1380_v1 = vor.u32 %v1759_v58, %v1379_v54  ;;  %v1367_v2 = vld [vmem:[#allocation2 + $0xf0] sm:$0xf] }
  0x1a   :  { %832 = vmatpush.bf16.msrb.mxu1 %v1416_v30  ;;  %859 = vmatpush.bf16.msra.mxu3 %v1620_v49  ;;  %v1284_v3 = vor.u32 %v1735_v60, %v1283_v59  ;;  %v1475_v4 = vld [vmem:[#allocation2 + $0x1c8] sm:$0xf]  ;;  %v1783_v5 = vld [vmem:[#allocation2 + $0x1d0] sm:$0xf0]  ;;  %v1756_v6 = vld [vmem:[#allocation2 + $0xf8] sm:$0xf0]  ;;  %v1596_v9 = vor.u32 %v1813_v0, %v1595_v63 }
  0x1b   :  { %819 = vmatpush.bf16.msra.mxu0 %v1308_v42  ;;  %v1271_v7 = vld [vmem:[#allocation2 + $0x30] sm:$0xf]  ;;  %v1732_v8 = vld [vmem:[#allocation2 + $0x38] sm:$0xf0]  ;;  %v1476_v10 = vor.u32 %v1783_v5, %v1475_v4  ;;  %v1583_v11 = vld [vmem:[#allocation2 + $0x2a0] sm:$0xf]  ;;  %v1368_v13 = vor.u32 %v1756_v6, %v1367_v2 }
  0x1c   :  { %846 = vmatpush.bf16.msrb.mxu2 %v1512_v38  ;;  %v1810_v12 = vld [vmem:[#allocation2 + $0x2a8] sm:$0xf0]  ;;  %v1355_v14 = vld [vmem:[#allocation2 + $0xd8] sm:$0xf]  ;;  %v1272_v15 = vor.u32 %v1732_v8, %v1271_v7  ;;  %v1463_v16 = vld [vmem:[#allocation2 + $0x1b0] sm:$0xf] }
  0x1d   :  { %v1780_v17 = vld [vmem:[#allocation2 + $0x1b8] sm:$0xf0]  ;;  %v1753_v19 = vld [vmem:[#allocation2 + $0xe0] sm:$0xf0]  ;;  %v1259_v20 = vld [vmem:[#allocation2 + $0x18] sm:$0xf]  ;;  %v1584_v22 = vor.u32 %v1810_v12, %v1583_v11 }
  0x1e   :  { %833 = vmatpush.bf16.msrb.mxu1 %v1404_v41  ;;  %860 = vmatpush.bf16.msra.mxu3 %v1608_v61  ;;  %v1729_v21 = vld [vmem:[#allocation2 + $0x20] sm:$0xf0]  ;;  %v1464_v23 = vor.u32 %v1780_v17, %v1463_v16  ;;  %v1343_v24 = vld [vmem:[#allocation2 + $0xc0] sm:$0xf]  ;;  %v1571_v25 = vld [vmem:[#allocation2 + $0x288] sm:$0xf]  ;;  %v1356_v27 = vor.u32 %v1753_v19, %v1355_v14 }
  0x1f   :  { %820 = vmatpush.bf16.msra.mxu0 %v1296_v55  ;;  %v1807_v26 = vld [vmem:[#allocation2 + $0x290] sm:$0xf0]  ;;  %v1750_v28 = vld [vmem:[#allocation2 + $0xc8] sm:$0xf0]  ;;  %v1260_v29 = vor.u32 %v1729_v21, %v1259_v20  ;;  %v1451_v30 = vld [vmem:[#allocation2 + $0x198] sm:$0xf] }
  0x20   :  { %847 = vmatpush.bf16.msrb.mxu2 %v1500_v50  ;;  %v1777_v31 = vld [vmem:[#allocation2 + $0x1a0] sm:$0xf0]  ;;  %v1770_v32 = vld [vmem:[#allocation2 + $0x16c] sm:$0xf]  ;;  %v1247_v33 = vld [vmem:[#allocation2] sm:$0xf]  ;;  %v1572_v37 = vor.u32 %v1807_v26, %v1571_v25  ;;  %v1344_v39 = vor.u32 %v1750_v28, %v1343_v24 }
  0x21   :  { %v1429_v34 = vld [vmem:[#allocation2 + $0x174] sm:$0xf0]  ;;  %v1746_v35 = vld [vmem:[#allocation2 + $0xac] sm:$0xf]  ;;  %v1452_v38 = vor.u32 %v1777_v31, %v1451_v30  ;;  %v1439_v41 = vld [vmem:[#allocation2 + $0x180] sm:$0xf] }
  0x22   :  { %834 = vmatpush.bf16.msrb.mxu1 %v1392_v53  ;;  %861 = vmatpush.bf16.msra.mxu3 %v1596_v9  ;;  %v1333_v36 = vld [vmem:[#allocation2 + $0xb4] sm:$0xf0]  ;;  %v1774_v42 = vld [vmem:[#allocation2 + $0x188] sm:$0xf0]  ;;  %v1432_v43 = vor.u32 %v1770_v32, %v1429_v34  ;;  %v1767_v44 = vld [vmem:[#allocation2 + $0x154] sm:$0xf] }
  0x23   :  { %821 = vmatpush.bf16.msra.mxu0 %v1284_v3  ;;  %v1336_v45 = vor.u32 %v1746_v35, %v1333_v36  ;;  %v1794_v46 = vld [vmem:[#allocation2 + $0x22c] sm:$0xf]  ;;  %v1525_v47 = vld [vmem:[#allocation2 + $0x234] sm:$0xf0]  ;;  %v1417_v48 = vld [vmem:[#allocation2 + $0x15c] sm:$0xf0]  ;;  %v1440_v51 = vor.u32 %v1774_v42, %v1439_v41 }
  0x24   :  { %848 = vmatpush.bf16.msrb.mxu2 %v1488_v62  ;;  %v1743_v49 = vld [vmem:[#allocation2 + $0x94] sm:$0xf]  ;;  %v1321_v50 = vld [vmem:[#allocation2 + $0x9c] sm:$0xf0]  ;;  %v1528_v52 = vor.u32 %v1794_v46, %v1525_v47  ;;  %v1420_v53 = vor.u32 %v1767_v44, %v1417_v48  ;;  %v1764_v57 = vld [vmem:[#allocation2 + $0x13c] sm:$0xf] }
  0x25   :  { %1244 = vmatmul.msk.bf16.vlgmr.msrb.gmra.mxu3 %vm84_vm1, %v1968_v18  ;;  %v1726_v18 = vld [vmem:[#allocation2 + $0x8] sm:$0xf0]  ;;  %v1324_v54 = vor.u32 %v1743_v49, %v1321_v50  ;;  %v1791_v55 = vld [vmem:[#allocation2 + $0x214] sm:$0xf]  ;;  %v1513_v56 = vld [vmem:[#allocation2 + $0x21c] sm:$0xf0] }
  0x26   :  { %835 = vmatpush.bf16.msrb.mxu1 %v1380_v1  ;;  %862 = vmatpush.bf16.msra.mxu3 %v1584_v22  ;;  %v1248_v40 = vor.u32 %v1726_v18, %v1247_v33  ;;  %v1405_v58 = vld [vmem:[#allocation2 + $0x144] sm:$0xf0]  ;;  %v1516_v59 = vor.u32 %v1791_v55, %v1513_v56  ;;  %v1761_v61 = vld [vmem:[#allocation2 + $0x124] sm:$0xf]  ;;  %v1393_v62 = vld [vmem:[#allocation2 + $0x12c] sm:$0xf0] }
  0x27   :  { %822 = vmatpush.bf16.msra.mxu0 %v1272_v15  ;;  %v1408_v60 = vor.u32 %v1764_v57, %v1405_v58  ;;  %v1396_v63 = vor.u32 %v1761_v61, %v1393_v62  ;;  %v1559_v0 = vld [vmem:[#allocation2 + $0x270] sm:$0xf]  ;;  %v1804_v1 = vld [vmem:[#allocation2 + $0x278] sm:$0xf0]  ;;  %v1309_v4 = vld [vmem:[#allocation2 + $0x84] sm:$0xf0] }
  0x28   :  { %849 = vmatpush.bf16.msrb.mxu2 %v1476_v10  ;;  %v1560_v2 = vor.u32 %v1804_v1, %v1559_v0  ;;  %v1740_v3 = vld [vmem:[#allocation2 + $0x7c] sm:$0xf]  ;;  %v1501_v7 = vld [vmem:[#allocation2 + $0x204] sm:$0xf0]  ;;  %v1758_v9 = vld [vmem:[#allocation2 + $0x10c] sm:$0xf] }
  0x29   :  { %v1788_v5 = vld [vmem:[#allocation2 + $0x1fc] sm:$0xf]  ;;  %v1312_v6 = vor.u32 %v1740_v3, %v1309_v4  ;;  %v1381_v10 = vld [vmem:[#allocation2 + $0x114] sm:$0xf0]  ;;  %v1737_v15 = vld [vmem:[#allocation2 + $0x64] sm:$0xf] }
  0x2a   :  { %836 = vmatpush.bf16.msrb.mxu1 %v1368_v13  ;;  %863 = vmatpush.bf16.msra.mxu3 %v1572_v37  ;;  %v1504_v8 = vor.u32 %v1788_v5, %v1501_v7  ;;  %v1384_v11 = vor.u32 %v1758_v9, %v1381_v10  ;;  %v1547_v12 = vld [vmem:[#allocation2 + $0x258] sm:$0xf]  ;;  %v1801_v13 = vld [vmem:[#allocation2 + $0x260] sm:$0xf0]  ;;  %v1297_v16 = vld [vmem:[#allocation2 + $0x6c] sm:$0xf0] }
  0x2b   :  { %823 = vmatpush.bf16.msra.mxu0 %v1260_v29  ;;  %v1548_v14 = vor.u32 %v1801_v13, %v1547_v12  ;;  %v1785_v17 = vld [vmem:[#allocation2 + $0x1e4] sm:$0xf]  ;;  %v1300_v19 = vor.u32 %v1737_v15, %v1297_v16  ;;  %v1489_v20 = vld [vmem:[#allocation2 + $0x1ec] sm:$0xf0]  ;;  %v1755_v22 = vld [vmem:[#allocation2 + $0xf4] sm:$0xf] }
  0x2c   :  { %850 = vmatpush.bf16.msrb.mxu2 %v1464_v23  ;;  %v1492_v21 = vor.u32 %v1785_v17, %v1489_v20  ;;  %v1369_v23 = vld [vmem:[#allocation2 + $0xfc] sm:$0xf0]  ;;  %v1798_v26 = vld [vmem:[#allocation2 + $0x248] sm:$0xf0]  ;;  %v1285_v29 = vld [vmem:[#allocation2 + $0x54] sm:$0xf0] }
  0x2d   :  { %v1372_v24 = vor.u32 %v1755_v22, %v1369_v23  ;;  %v1535_v25 = vld [vmem:[#allocation2 + $0x240] sm:$0xf]  ;;  %v1734_v28 = vld [vmem:[#allocation2 + $0x4c] sm:$0xf]  ;;  %v1477_v32 = vld [vmem:[#allocation2 + $0x1d4] sm:$0xf0] }
  0x2e   :  { %837 = vmatpush.bf16.msrb.mxu1 %v1356_v27  ;;  %864 = vmatpush.bf16.msra.mxu3 %v1560_v2  ;;  %v1536_v27 = vor.u32 %v1798_v26, %v1535_v25  ;;  %v1782_v30 = vld [vmem:[#allocation2 + $0x1cc] sm:$0xf]  ;;  %v1288_v31 = vor.u32 %v1734_v28, %v1285_v29  ;;  %v1621_v18 = vld [vmem:[#allocation2 + $0x2f4] sm:$0xf0]  ;;  %v1752_v36 = vld [vmem:[#allocation2 + $0xdc] sm:$0xf] }
  0x2f   :  { %824 = vmatpush.bf16.msra.mxu0 %v1248_v40  ;;  %v1818_v33 = vld [vmem:[#allocation2 + $0x2ec] sm:$0xf]  ;;  %v1480_v34 = vor.u32 %v1782_v30, %v1477_v32  ;;  %v1357_v37 = vld [vmem:[#allocation2 + $0xe4] sm:$0xf0]  ;;  %v1273_v40 = vld [vmem:[#allocation2 + $0x3c] sm:$0xf0] }
  0x30   :  { %851 = vmatpush.bf16.msrb.mxu2 %v1452_v38  ;;  %v1624_v35 = vor.u32 %v1818_v33, %v1621_v18  ;;  %v1360_v38 = vor.u32 %v1752_v36, %v1357_v37  ;;  %v1779_v41 = vld [vmem:[#allocation2 + $0x1b4] sm:$0xf]  ;;  %v1749_v48 = vld [vmem:[#allocation2 + $0xc4] sm:$0xf]  ;;  %v1345_v49 = vld [vmem:[#allocation2 + $0xcc] sm:$0xf0] }
  0x31   :  { %v1815_v44 = vld [vmem:[#allocation2 + $0x2d4] sm:$0xf]  ;;  %v1348_v50 = vor.u32 %v1749_v48, %v1345_v49  ;;  %v1453_v55 = vld [vmem:[#allocation2 + $0x1a4] sm:$0xf0]  ;;  %v1812_v56 = vld [vmem:[#allocation2 + $0x2bc] sm:$0xf] }
  0x32   :  { %838 = vmatpush.bf16.msrb.mxu1 %v1344_v39  ;;  %865 = vmatpush.bf16.msra.mxu3 %v1548_v14  ;;  %v1731_v39 = vld [vmem:[#allocation2 + $0x34] sm:$0xf]  ;;  %v1597_v57 = vld [vmem:[#allocation2 + $0x2c4] sm:$0xf0]  ;;  %v1249_v61 = vld [vmem:[#allocation2 + $0xc] sm:$0xf0] }
  0x33   :  { %873 = vmatpush.bf16.msrb.mxu0 %v1336_v45  ;;  %v1276_v42 = vor.u32 %v1731_v39, %v1273_v40  ;;  %v1609_v45 = vld [vmem:[#allocation2 + $0x2dc] sm:$0xf0]  ;;  %v1773_v62 = vld [vmem:[#allocation2 + $0x184] sm:$0xf]  ;;  %v1441_v0 = vld [vmem:[#allocation2 + $0x18c] sm:$0xf0] }
  0x34   :  { %852 = vmatpush.bf16.msrb.mxu2 %v1440_v51  ;;  %v1612_v47 = vor.u32 %v1815_v44, %v1609_v45  ;;  %v1728_v51 = vld [vmem:[#allocation2 + $0x1c] sm:$0xf]  ;;  %v1809_v1 = vld [vmem:[#allocation2 + $0x2a4] sm:$0xf]  ;;  %v1585_v2 = vld [vmem:[#allocation2 + $0x2ac] sm:$0xf0]  ;;  %v1444_v3 = vor.u32 %v1773_v62, %v1441_v0 }
  0x35   :  { %v1588_v4 = vor.u32 %v1809_v1, %v1585_v2  ;;  %v1806_v5 = vld [vmem:[#allocation2 + $0x28c] sm:$0xf]  ;;  %v1561_v9 = vld [vmem:[#allocation2 + $0x27c] sm:$0xf0]  ;;  %v1549_v12 = vld [vmem:[#allocation2 + $0x264] sm:$0xf0] }
  0x36   :  { %887 = vmatpush.bf16.msra.mxu1 %v1432_v43  ;;  %866 = vmatpush.bf16.msra.mxu3 %v1536_v27  ;;  %v1465_v43 = vld [vmem:[#allocation2 + $0x1bc] sm:$0xf0]  ;;  %v1797_v17 = vld [vmem:[#allocation2 + $0x244] sm:$0xf]  ;;  %v1435_v29 = vld [vmem:[#allocation2 + $0x170] sm:$0xf] }
  0x37   :  { %874 = vmatpush.bf16.msrb.mxu0 %v1324_v54  ;;  %v1468_v46 = vor.u32 %v1779_v41, %v1465_v43  ;;  %v1985_v13 = vld [vmem:[%s2025_s2] sm:$0xf]  ;;  %v1772_v30 = vld [vmem:[#allocation2 + $0x178] sm:$0xf0]  ;;  %v1769_v36 = vld [vmem:[#allocation2 + $0x160] sm:$0xf0] }
  0x38   :  { %901 = vmatpush.bf16.msra.mxu2 %v1528_v52  ;;  %v1261_v52 = vld [vmem:[#allocation2 + $0x24] sm:$0xf0]  ;;  %v67_v16 = vperm.slane %v1985_v13, 1  ;;  %v66_v27 = vperm.slane %v1985_v13, 0  ;;  %v1436_v33 = vor.u32 %v1772_v30, %v1435_v29  ;;  %v1339_v40 = vld [vmem:[#allocation2 + $0xb0] sm:$0xf] }
  0x39   :  { %v1264_v54 = vor.u32 %v1728_v51, %v1261_v52  ;;  %v1748_v41 = vld [vmem:[#allocation2 + $0xb8] sm:$0xf0]  ;;  %v1531_v45 = vld [vmem:[#allocation2 + $0x230] sm:$0xf]  ;;  %v1411_v49 = vld [vmem:[#allocation2 + $0x140] sm:$0xf] }
  0x3a   :  { %888 = vmatpush.bf16.msra.mxu1 %v1420_v53  ;;  %915 = vmatpush.bf16.msrb.mxu3 %v1624_v35  ;;  %v1776_v53 = vld [vmem:[#allocation2 + $0x19c] sm:$0xf]  ;;  %v1423_v35 = vld [vmem:[#allocation2 + $0x158] sm:$0xf]  ;;  %v1340_v52 = vor.u32 %v1748_v41, %v1339_v40  ;;  %v1763_v62 = vld [vmem:[#allocation2 + $0x130] sm:$0xf0] }
  0x3b   :  { %875 = vmatpush.bf16.msrb.mxu0 %v1312_v6  ;;  %v1456_v58 = vor.u32 %v1776_v53, %v1453_v55  ;;  %v1573_v6 = vld [vmem:[#allocation2 + $0x294] sm:$0xf0]  ;;  %v1424_v44 = vor.u32 %v1769_v36, %v1423_v35  ;;  %v1315_v2 = vld [vmem:[#allocation2 + $0x80] sm:$0xf]  ;;  %v1784_v29 = vld [vmem:[#allocation2 + $0x1d8] sm:$0xf0] }
  0x3c   :  { %902 = vmatpush.bf16.msra.mxu2 %v1516_v59  ;;  %v1600_v59 = vor.u32 %v1812_v56, %v1597_v57  ;;  %v1576_v7 = vor.u32 %v1806_v5, %v1573_v6  ;;  %v1327_v55 = vld [vmem:[#allocation2 + $0x98] sm:$0xf]  ;;  %v1745_v56 = vld [vmem:[#allocation2 + $0xa0] sm:$0xf0]  ;;  %v1507_v5 = vld [vmem:[#allocation2 + $0x200] sm:$0xf] }
  0x3d   :  { %v1328_v0 = vor.u32 %v1745_v56, %v1327_v55  ;;  %v1790_v6 = vld [vmem:[#allocation2 + $0x208] sm:$0xf0]  ;;  %v1627_v30 = vld [vmem:[#allocation2 + $0x2f0] sm:$0xf]  ;;  %v1279_v40 = vld [vmem:[#allocation2 + $0x38] sm:$0xf] }
  0x3e   :  { %889 = vmatpush.bf16.msra.mxu1 %v1408_v60  ;;  %916 = vmatpush.bf16.msrb.mxu3 %v1612_v47  ;;  %v1725_v60 = vld [vmem:[#allocation2 + $0x4] sm:$0xf]  ;;  %v1754_v35 = vld [vmem:[#allocation2 + $0xe8] sm:$0xf0]  ;;  %v1459_v55 = vld [vmem:[#allocation2 + $0x1a0] sm:$0xf] }
  0x3f   :  { %876 = vmatpush.bf16.msrb.mxu0 %v1300_v19  ;;  %v1537_v19 = vld [vmem:[#allocation2 + $0x24c] sm:$0xf0]  ;;  %v1733_v41 = vld [vmem:[#allocation2 + $0x40] sm:$0xf0]  ;;  %vm1232_vm2 = vcmask 31744  }
  0x40   :  { %903 = vmatpush.bf16.msra.mxu2 %v1504_v8  ;;  %v1803_v8 = vld [vmem:[#allocation2 + $0x274] sm:$0xf]  ;;  %v1540_v20 = vor.u32 %v1797_v17, %v1537_v19 }
  0x41   :  { %v1564_v10 = vor.u32 %v1803_v8, %v1561_v9  ;;  %v1387_v8 = vld [vmem:[#allocation2 + $0x110] sm:$0xf]  ;;  %v1760_v9 = vld [vmem:[#allocation2 + $0x118] sm:$0xf0]  ;;  %v1787_v17 = vld [vmem:[#allocation2 + $0x1f0] sm:$0xf0] }
  0x42   :  { %890 = vmatpush.bf16.msra.mxu1 %v1396_v63  ;;  %917 = vmatpush.bf16.msrb.mxu3 %v1600_v59  ;;  %v1252_v63 = vor.u32 %v1725_v60, %v1249_v61  ;;  %v1519_v59 = vld [vmem:[#allocation2 + $0x218] sm:$0xf]  ;;  %v1793_v60 = vld [vmem:[#allocation2 + $0x220] sm:$0xf0]  ;;  %v1399_v61 = vld [vmem:[#allocation2 + $0x128] sm:$0xf] }
  0x43   :  { %877 = vmatpush.bf16.msrb.mxu0 %v1288_v31  ;;  %v1520_v1 = vor.u32 %v1793_v60, %v1519_v59  ;;  %v1603_v59 = vld [vmem:[#allocation2 + $0x2c0] sm:$0xf]  ;;  %v1814_v60 = vld [vmem:[#allocation2 + $0x2c8] sm:$0xf0] }
  0x44   :  { %904 = vmatpush.bf16.msra.mxu2 %v1492_v21 }
  0x46   :  { %891 = vmatpush.bf16.msra.mxu1 %v1384_v11  ;;  %918 = vmatpush.bf16.msrb.mxu3 %v1588_v4  ;;  %v1800_v11 = vld [vmem:[#allocation2 + $0x25c] sm:$0xf]  ;;  %v1400_v4 = vor.u32 %v1763_v62, %v1399_v61 }
  0x47   :  { %878 = vmatpush.bf16.msrb.mxu0 %v1276_v42  ;;  %v1552_v15 = vor.u32 %v1800_v11, %v1549_v12  ;;  %v1508_v11 = vor.u32 %v1790_v6, %v1507_v5  ;;  %v1303_v12 = vld [vmem:[#allocation2 + $0x68] sm:$0xf]  ;;  %v1811_v5 = vld [vmem:[#allocation2 + $0x2b0] sm:$0xf0] }
  0x48   :  { %905 = vmatpush.bf16.msra.mxu2 %v1480_v34 }
  0x4a   :  { %892 = vmatpush.bf16.msra.mxu1 %v1372_v24  ;;  %919 = vmatpush.bf16.msrb.mxu3 %v1576_v7  ;;  %v68_v24 = vperm.slane %v1985_v13, 2  ;;  %v69_v7 = vperm.slane %v1985_v13, 3 }
  0x4b   :  { %879 = vmatpush.bf16.msrb.mxu0 %v1264_v54 }
  0x4c   :  { %906 = vmatpush.bf16.msra.mxu2 %v1468_v46  ;;  %v1796_v46 = vld [vmem:[#allocation2 + $0x238] sm:$0xf0] }
  0x4d   :  { %v1532_v54 = vor.u32 %v1796_v46, %v1531_v45  ;;  %v1615_v45 = vld [vmem:[#allocation2 + $0x2d8] sm:$0xf]  ;;  %v1817_v46 = vld [vmem:[#allocation2 + $0x2e0] sm:$0xf0] }
  0x4e   :  { %893 = vmatpush.bf16.msra.mxu1 %v1360_v38  ;;  %920 = vmatpush.bf16.msrb.mxu3 %v1564_v10 }
  0x4f   :  { %880 = vmatpush.bf16.msrb.mxu0 %v1252_v63 }
  0x50   :  { %907 = vmatpush.bf16.msra.mxu2 %v1456_v58 }
  0x52   :  { %894 = vmatpush.bf16.msra.mxu1 %v1348_v50  ;;  %921 = vmatpush.bf16.msrb.mxu3 %v1552_v15  ;;  %v1766_v50 = vld [vmem:[#allocation2 + $0x148] sm:$0xf0]  ;;  %v1388_v15 = vor.u32 %v1760_v9, %v1387_v8  ;;  %v1579_v9 = vld [vmem:[#allocation2 + $0x290] sm:$0xf] }
  0x53   :  { %v1412_v58 = vor.u32 %v1766_v50, %v1411_v49  ;;  %v1280_v49 = vor.u32 %v1733_v41, %v1279_v40  ;;  %v1842_v40 = vld [vmem:[#allocation4 + $0xa8] sm:$0xff]  ;;  %v297_v41 = vld [vmem:[%s2027_s4] sm:$0x7] }
  0x54   :  { %908 = vmatpush.bf16.msra.mxu2 %v1444_v3  ;;  %v1742_v3 = vld [vmem:[#allocation2 + $0x88] sm:$0xf0] }
  0x55   :  { %v1316_v10 = vor.u32 %v1742_v3, %v1315_v2  ;;  %v1447_v2 = vld [vmem:[#allocation2 + $0x188] sm:$0xf]  ;;  %v1775_v3 = vld [vmem:[#allocation2 + $0x190] sm:$0xf0] }
  0x56   :  { %922 = vmatpush.bf16.msrb.mxu3 %v1540_v20  ;;  %v1375_v20 = vld [vmem:[#allocation2 + $0xf8] sm:$0xf] }
  0x92   :  { %v124_v14 = vpop.f32.mrf.mxu1 }
  0x93   :  { %v125_v21 = vadd.f32 %v124_v14, %v67_v16  ;;  %v1739_v14 = vld [vmem:[#allocation2 + $0x70] sm:$0xf0] }
  0x95   :  { %v158_v26 = vmax.f32 %v125_v21, 0.0  ;;  %v1757_v21 = vld [vmem:[#allocation2 + $0x100] sm:$0xf0] }
  0x98   :  { %v110_v22 = vpop.f32.mrf.mxu3 }
  0x99   :  { %v111_v18 = vadd.f32 %v110_v22, %v66_v27 }
  0x9a   :  { %v138_v23 = vpop.f32.mrf.mxu2  ;;  %v126_v25 = vpop.f32.mrf.mxu1 }
  0x9b   :  { %v127_v28 = vadd.f32 %v126_v25, %v67_v16  ;;  %v139_v32 = vadd.f32 %v138_v23, %v68_v24  ;;  %v157_v47 = vmax.f32 %v111_v18, 0.0  ;;  %v1495_v16 = vld [vmem:[#allocation2 + $0x1e8] sm:$0xf]  ;;  %v1304_v23 = vor.u32 %v1739_v14, %v1303_v12  ;;  %v1291_v25 = vld [vmem:[#allocation2 + $0x50] sm:$0xf] }
  0x9c   :  { %v1496_v13 = vor.u32 %v1787_v17, %v1495_v16  ;;  %v1363_v18 = vld [vmem:[#allocation2 + $0xe0] sm:$0xf]  ;;  %v1567_v12 = vld [vmem:[#allocation2 + $0x278] sm:$0xf]  ;;  %v1805_v14 = vld [vmem:[#allocation2 + $0x280] sm:$0xf0] }
  0x9d   :  { %v162_v31 = vmax.f32 %v127_v28, 0.0  ;;  %v159_v42 = vmax.f32 %v139_v32, 0.0  ;;  %v1376_v28 = vor.u32 %v1757_v21, %v1375_v20  ;;  %v1555_v16 = vld [vmem:[#allocation2 + $0x260] sm:$0xf]  ;;  %v1802_v17 = vld [vmem:[#allocation2 + $0x268] sm:$0xf0] }
  0x9e   :  { %v1799_v20 = vld [vmem:[#allocation2 + $0x250] sm:$0xf0] }
  0x9f   :  { %v1990_v34 = vpack.c.bf16 %v162_v31, %v158_v26  ;;  %v1736_v26 = vld [vmem:[#allocation2 + $0x58] sm:$0xf0] }
  0xa0   :  { %v112_v37 = vpop.f32.mrf.mxu3  ;;  %v1820_v31 = vld [vmem:[#allocation2 + $0x2f8] sm:$0xf0]  ;;  %v1292_v36 = vor.u32 %v1736_v26, %v1291_v25  ;;  %v1823_v25 = vld [vmem:[#allocation4 + $0x10] sm:$0xff] }
  0xa1   :  { %v113_v38 = vadd.f32 %v112_v37, %v66_v27  ;;  %839 = vmatmul.bf16.vlgmr.msrb.gmra.mxu1 %v1990_v34  ;;  %v1483_v27 = vld [vmem:[#allocation2 + $0x1d0] sm:$0xf] }
  0xa2   :  { %v140_v39 = vpop.f32.mrf.mxu2  ;;  %943 = vmatpush.bf16.msrb.mxu1 %v1436_v33  ;;  %v1835_v26 = vld [vmem:[#allocation4 + $0x70] sm:$0xff] }
  0xa3   :  { %v141_v43 = vadd.f32 %v140_v39, %v68_v24  ;;  %v161_v48 = vmax.f32 %v113_v38, 0.0  ;;  %v1484_v38 = vor.u32 %v1784_v29, %v1483_v27  ;;  %v1628_v39 = vor.u32 %v1820_v31, %v1627_v30  ;;  %v1822_v27 = vld [vmem:[#allocation4 + $0x8] sm:$0xff]  ;;  %v1821_v29 = vld [vmem:[#allocation4] sm:$0xff] }
  0xa4   :  { %v1833_v30 = vld [vmem:[#allocation4 + $0x60] sm:$0xff] }
  0xa5   :  { %v163_v51 = vmax.f32 %v141_v43, 0.0  ;;  %v1993_v53 = vpack.c.bf16 %v161_v48, %v157_v47  ;;  %v1364_v43 = vor.u32 %v1754_v35, %v1363_v18  ;;  %v1351_v47 = vld [vmem:[#allocation2 + $0xc8] sm:$0xf]  ;;  %v1751_v48 = vld [vmem:[#allocation2 + $0xd0] sm:$0xf0] }
  0xa6   :  { %944 = vmatpush.bf16.msrb.mxu1 %v1424_v44  ;;  %v1781_v44 = vld [vmem:[#allocation2 + $0x1c0] sm:$0xf0]  ;;  %v1352_v56 = vor.u32 %v1751_v48, %v1351_v47  ;;  %v1840_v48 = vld [vmem:[#allocation4 + $0x98] sm:$0xff] }
  0xa7   :  { %v1995_v57 = vpack.c.bf16 %v163_v51, %v159_v42  ;;  %825 = vmatmul.bf16.vlgmr.msra.gmra.mxu0 %v1993_v53  ;;  %v1471_v42 = vld [vmem:[#allocation2 + $0x1b8] sm:$0xf]  ;;  %v1616_v51 = vor.u32 %v1817_v46, %v1615_v45 }
  0xa8   :  { %v152_v63 = vpop.f32.mrf.mxu3  ;;  %929 = vmatpush.bf16.msra.mxu0 %v1340_v52  ;;  %v1472_v50 = vor.u32 %v1781_v44, %v1471_v42  ;;  %v1267_v52 = vld [vmem:[#allocation2 + $0x20] sm:$0xf]  ;;  %v299_v42 = vperm.slane %v297_v41, 0 }
  0xa9   :  { %853 = vmatmul.bf16.vlgmr.msrb.gmra.mxu2 %v1995_v57  ;;  %v153_v19 = vadd.f32 %v152_v63, %v69_v7  ;;  %v1604_v63 = vor.u32 %v1814_v60, %v1603_v59  ;;  %v1841_v44 = vld [vmem:[#allocation4 + $0xa0] sm:$0xff] }
  0xaa   :  { %957 = vmatpush.bf16.msrb.mxu2 %v1532_v54  ;;  %945 = vmatpush.bf16.msrb.mxu1 %v1412_v58  ;;  %v1730_v54 = vld [vmem:[#allocation2 + $0x28] sm:$0xf0] }
  0xab   :  { %v160_v32 = vmax.f32 %v153_v19, 0.0  ;;  %v1778_v58 = vld [vmem:[#allocation2 + $0x1a8] sm:$0xf0]  ;;  %v1268_v61 = vor.u32 %v1730_v54, %v1267_v52  ;;  %v1543_v19 = vld [vmem:[#allocation2 + $0x248] sm:$0xf]  ;;  %v1839_v54 = vld [vmem:[#allocation4 + $0x90] sm:$0xff] }
  0xac   :  { %930 = vmatpush.bf16.msra.mxu0 %v1328_v0  ;;  %v1460_v62 = vor.u32 %v1778_v58, %v1459_v55  ;;  %v1255_v0 = vld [vmem:[#allocation2 + $0x8] sm:$0xf]  ;;  %v1544_v21 = vor.u32 %v1799_v20, %v1543_v19 }
  0xae   :  { %958 = vmatpush.bf16.msrb.mxu2 %v1520_v1  ;;  %946 = vmatpush.bf16.msrb.mxu1 %v1400_v4  ;;  %v1727_v1 = vld [vmem:[#allocation2 + $0x10] sm:$0xf0]  ;;  %v1591_v4 = vld [vmem:[#allocation2 + $0x2a8] sm:$0xf] }
  0xaf   :  { %v1256_v6 = vor.u32 %v1727_v1, %v1255_v0  ;;  %v1592_v8 = vor.u32 %v1811_v5, %v1591_v4  ;;  %v300_v1 = vperm.slane %v297_v41, 1  ;;  %v1837_v5 = vld [vmem:[#allocation4 + $0x80] sm:$0xff] }
  0xb0   :  { %v154_v22 = vpop.f32.mrf.mxu3  ;;  %931 = vmatpush.bf16.msra.mxu0 %v1316_v10  ;;  %v1808_v10 = vld [vmem:[#allocation2 + $0x298] sm:$0xf0] }
  0xb1   :  { %v155_v24 = vadd.f32 %v154_v22, %v69_v7  ;;  %895 = vmatmul.bf16.vlgmr.msra.gmra.mxu1 %v1990_v34  ;;  %v1448_v7 = vor.u32 %v1775_v3, %v1447_v2  ;;  %v1828_v22 = vld [vmem:[#allocation4 + $0x38] sm:$0xff] }
  0xb2   :  { %959 = vmatpush.bf16.msrb.mxu2 %v1508_v11  ;;  %947 = vmatpush.bf16.msrb.mxu1 %v1388_v15  ;;  %v1580_v11 = vor.u32 %v1808_v10, %v1579_v9  ;;  %v1568_v15 = vor.u32 %v1805_v14, %v1567_v12 }
  0xb3   :  { %v164_v33 = vmax.f32 %v155_v24, 0.0  ;;  %v1824_v24 = vld [vmem:[#allocation4 + $0x18] sm:$0xff] }
  0xb4   :  { %932 = vmatpush.bf16.msra.mxu0 %v1304_v23  ;;  %v1827_v23 = vld [vmem:[#allocation4 + $0x30] sm:$0xff] }
  0xb5   :  { %v2001_v37 = vpack.c.bf16 %v164_v33, %v160_v32  ;;  %v1832_v32 = vld [vmem:[#allocation4 + $0x58] sm:$0xff] }
  0xb6   :  { %960 = vmatpush.bf16.msrb.mxu2 %v1496_v13  ;;  %948 = vmatpush.bf16.msrb.mxu1 %v1376_v28  ;;  %v1836_v13 = vld [vmem:[#allocation4 + $0x78] sm:$0xff]  ;;  %v1834_v28 = vld [vmem:[#allocation4 + $0x68] sm:$0xff] }
  0xb7   :  { %867 = vmatmul.bf16.vlgmr.msra.gmra.mxu3 %v2001_v37  ;;  %881 = vmatmul.bf16.vlgmr.msrb.gmra.mxu0 %v1993_v53  ;;  %v1844_v33 = vld [vmem:[#allocation4 + $0xb8] sm:$0xff] }
  0xb8   :  { %933 = vmatpush.bf16.msra.mxu0 %v1292_v36  ;;  %971 = vmatpush.bf16.msra.mxu3 %v1628_v39  ;;  %v1831_v36 = vld [vmem:[#allocation4 + $0x50] sm:$0xff]  ;;  %v1830_v39 = vld [vmem:[#allocation4 + $0x48] sm:$0xff] }
  0xb9   :  { %909 = vmatmul.bf16.vlgmr.msra.gmra.mxu2 %v1995_v57 }
  0xba   :  { %961 = vmatpush.bf16.msrb.mxu2 %v1484_v38  ;;  %949 = vmatpush.bf16.msrb.mxu1 %v1364_v43  ;;  %v1829_v43 = vld [vmem:[#allocation4 + $0x40] sm:$0xff] }
  0xbc   :  { %934 = vmatpush.bf16.msra.mxu0 %v1280_v49  ;;  %972 = vmatpush.bf16.msra.mxu3 %v1616_v51 }
  0xbe   :  { %962 = vmatpush.bf16.msrb.mxu2 %v1472_v50  ;;  %950 = vmatpush.bf16.msrb.mxu1 %v1352_v56 }
  0xc0   :  { %935 = vmatpush.bf16.msra.mxu0 %v1268_v61  ;;  %973 = vmatpush.bf16.msra.mxu3 %v1604_v63 }
  0xc1   :  { %951 = vmatmul.bf16.vlgmr.msrb.gmra.mxu1 %v1990_v34  ;;  %v1556_v34 = vor.u32 %v1802_v17, %v1555_v16 }
  0xc2   :  { %963 = vmatpush.bf16.msrb.mxu2 %v1460_v62  ;;  %1204 = vmatpush.bf16.msra.mxu1 %v1836_v13  ;;  %v1838_v62 = vld [vmem:[#allocation4 + $0x88] sm:$0xff] }
  0xc4   :  { %936 = vmatpush.bf16.msra.mxu0 %v1256_v6  ;;  %974 = vmatpush.bf16.msra.mxu3 %v1592_v8 }
  0xc6   :  { %964 = vmatpush.bf16.msrb.mxu2 %v1448_v7  ;;  %1205 = vmatpush.bf16.msra.mxu1 %v1835_v26 }
  0xc7   :  { %923 = vmatmul.bf16.vlgmr.msrb.gmra.mxu3 %v2001_v37  ;;  %937 = vmatmul.bf16.vlgmr.msra.gmra.mxu0 %v1993_v53  ;;  %v1826_v53 = vld [vmem:[#allocation4 + $0x28] sm:$0xff] }
  0xc8   :  { %975 = vmatpush.bf16.msra.mxu3 %v1580_v11  ;;  %1190 = vmatpush.bf16.msrb.mxu0 %v1828_v22 }
  0xc9   :  { %965 = vmatmul.bf16.vlgmr.msrb.gmra.mxu2 %v1995_v57  ;;  %v1825_v57 = vld [vmem:[#allocation4 + $0x20] sm:$0xff] }
  0xca   :  { %1206 = vmatpush.bf16.msra.mxu1 %v1834_v28  ;;  %1218 = vmatpush.bf16.msra.mxu2 %v1844_v33 }
  0xcc   :  { %976 = vmatpush.bf16.msra.mxu3 %v1568_v15  ;;  %1191 = vmatpush.bf16.msrb.mxu0 %v1827_v23 }
  0xce   :  { %1207 = vmatpush.bf16.msra.mxu1 %v1833_v30 }
  0xd0   :  { %977 = vmatpush.bf16.msra.mxu3 %v1556_v34  ;;  %1192 = vmatpush.bf16.msrb.mxu0 %v1826_v53 }
  0xd2   :  { %1208 = vmatpush.bf16.msra.mxu1 %v1832_v32 }
  0xd4   :  { %978 = vmatpush.bf16.msra.mxu3 %v1544_v21  ;;  %1193 = vmatpush.bf16.msrb.mxu0 %v1825_v57  ;;  %v301_v57 = vperm.slane %v297_v41, 2  ;;  %v1851_v41 = vld [vmem:[%s2029_s6] ss:$0 sm:$0xff] }
  0xd6   :  { %1209 = vmatpush.bf16.msra.mxu1 %v1831_v36 }
  0xd7   :  { %979 = vmatmul.bf16.vlgmr.msra.gmra.mxu3 %v2001_v37  ;;  %v1843_v37 = vld [vmem:[#allocation4 + $0xb0] sm:$0xff] }
  0xd8   :  { %1194 = vmatpush.bf16.msrb.mxu0 %v1824_v24  ;;  %1219 = vmatpush.bf16.msra.mxu2 %v1843_v37 }
  0xda   :  { %1210 = vmatpush.bf16.msra.mxu1 %v1830_v39 }
  0xdc   :  { %1195 = vmatpush.bf16.msrb.mxu0 %v1823_v25  ;;  %1220 = vmatpush.bf16.msra.mxu2 %v1842_v40 }
  0xde   :  { %1211 = vmatpush.bf16.msra.mxu1 %v1829_v43 }
  0xe0   :  { %1196 = vmatpush.bf16.msrb.mxu0 %v1822_v27  ;;  %1221 = vmatpush.bf16.msra.mxu2 %v1841_v44 }
  0xe4   :  { %1197 = vmatpush.bf16.msrb.mxu0 %v1821_v29  ;;  %1222 = vmatpush.bf16.msra.mxu2 %v1840_v48 }
  0xe8   :  { %1223 = vmatpush.bf16.msra.mxu2 %v1839_v54 }
  0xec   :  { %1224 = vmatpush.bf16.msra.mxu2 %v1838_v62 }
  0xf0   :  { %1225 = vmatpush.bf16.msra.mxu2 %v1837_v5 }
 0x11e   :  { %v840_v18 = vpop.f32.mrf.mxu1 }
 0x124   :  { %v826_v31 = vpop.f32.mrf.mxu0 }
 0x125   :  { %v827_v47 = vadd.f32 %v826_v31, %v299_v42 }
 0x126   :  { %v842_v45 = vpop.f32.mrf.mxu1 }
 0x127   :  { %v841_v52 = vadd.f32 %v840_v18, %v827_v47 }
 0x12c   :  { %v854_v35 = vpop.f32.mrf.mxu2  ;;  %v828_v38 = vpop.f32.mrf.mxu0 }
 0x12d   :  { %v829_v50 = vadd.f32 %v828_v38, %v299_v42  ;;  %v855_v55 = vadd.f32 %v854_v35, %v841_v52 }
 0x12e   :  { %v896_v58 = vpop.f32.mrf.mxu1 }
 0x12f   :  { %v843_v56 = vadd.f32 %v842_v45, %v829_v50 }
 0x134   :  { %v856_v46 = vpop.f32.mrf.mxu2  ;;  %v882_v51 = vpop.f32.mrf.mxu0 }
 0x135   :  { %v857_v59 = vadd.f32 %v856_v46, %v843_v56  ;;  %v883_v7 = vadd.f32 %v882_v51, %v300_v1 }
 0x136   :  { %v898_v9 = vpop.f32.mrf.mxu1 }
 0x137   :  { %v897_v12 = vadd.f32 %v896_v58, %v883_v7 }
 0x13a   :  { %v868_v49 = vpop.f32.mrf.mxu3 }
 0x13b   :  { %v869_v60 = vadd.f32 %v868_v49, %v855_v55 }
 0x13c   :  { %v910_v61 = vpop.f32.mrf.mxu2  ;;  %v884_v3 = vpop.f32.mrf.mxu0 }
 0x13d   :  { %v985_v2 = vmax.f32 %v869_v60, 0.0  ;;  %v885_v10 = vadd.f32 %v884_v3, %v300_v1  ;;  %v911_v14 = vadd.f32 %v910_v61, %v897_v12 }
 0x13e   :  { %v952_v21 = vpop.f32.mrf.mxu1 }
 0x13f   :  { %v899_v15 = vadd.f32 %v898_v9, %v885_v10 }
 0x142   :  { %v870_v63 = vpop.f32.mrf.mxu3 }
 0x143   :  { %v871_v0 = vadd.f32 %v870_v63, %v857_v59 }
 0x144   :  { %v912_v11 = vpop.f32.mrf.mxu2  ;;  %v938_v16 = vpop.f32.mrf.mxu0 }
 0x145   :  { %v988_v4 = vmax.f32 %v871_v0, 0.0  ;;  %v913_v17 = vadd.f32 %v912_v11, %v899_v15  ;;  %v939_v25 = vadd.f32 %v938_v16, %v301_v57 }
 0x146   :  { %v954_v29 = vpop.f32.mrf.mxu1 }
 0x147   :  { %v991_v6 = vpack.c.bf16 %v988_v4, %v985_v2  ;;  %v953_v28 = vadd.f32 %v952_v21, %v939_v25 }
 0x149   :  { %1198 = vmatmul.bf16.vlgmr.msrb.gmra.mxu0 %v991_v6 }
 0x14a   :  { %v924_v8 = vpop.f32.mrf.mxu3 }
 0x14b   :  { %v925_v34 = vadd.f32 %v924_v8, %v911_v14 }
 0x14c   :  { %v966_v23 = vpop.f32.mrf.mxu2  ;;  %v940_v13 = vpop.f32.mrf.mxu0 }
 0x14d   :  { %v986_v22 = vmax.f32 %v925_v34, 0.0  ;;  %v941_v27 = vadd.f32 %v940_v13, %v301_v57  ;;  %v967_v31 = vadd.f32 %v966_v23, %v953_v28 }
 0x14f   :  { %v955_v32 = vadd.f32 %v954_v29, %v941_v27 }
 0x152   :  { %v926_v19 = vpop.f32.mrf.mxu3 }
 0x153   :  { %v927_v20 = vadd.f32 %v926_v19, %v913_v17 }
 0x154   :  { %v968_v30 = vpop.f32.mrf.mxu2 }
 0x155   :  { %v989_v53 = vmax.f32 %v927_v20, 0.0  ;;  %v969_v33 = vadd.f32 %v968_v30, %v955_v32 }
 0x157   :  { %v992_v24 = vpack.c.bf16 %v989_v53, %v986_v22 }
 0x159   :  { %1212 = vmatmul.bf16.vlgmr.msra.gmra.mxu1 %v992_v24 }
 0x15a   :  { %v980_v26 = vpop.f32.mrf.mxu3 }
 0x15b   :  { %v981_v18 = vadd.f32 %v980_v26, %v967_v31 }
 0x15d   :  { %v987_v37 = vmax.f32 %v981_v18, 0.0 }
 0x162   :  { %v982_v35 = vpop.f32.mrf.mxu3 }
 0x163   :  { %v983_v36 = vadd.f32 %v982_v35, %v969_v33 }
 0x165   :  { %v990_v38 = vmax.f32 %v983_v36, 0.0 }
 0x167   :  { %v993_v39 = vpack.c.bf16 %v990_v38, %v987_v37 }
 0x169   :  { %1226 = vmatmul.bf16.vlgmr.msra.gmra.mxu2 %v993_v39 }
 0x1c6   :  { %v1199_v40 = vpop.f32.mrf.mxu0 }
 0x1c7   :  { %v1200_v43 = vadd.f32 %v1851_v41, %v1199_v40 }
 0x1ce   :  { %v1201_v47 = vpop.f32.mrf.mxu0 }
 0x1cf   :  { %v1202_v49 = vadd.f32 %v1851_v41, %v1201_v47 }
 0x1d6   :  { %v1213_v42 = vpop.f32.mrf.mxu1 }
 0x1d7   :  { %v1214_v44 = vadd.f32 %v1213_v42, %v1200_v43 }
 0x1de   :  { %v1215_v48 = vpop.f32.mrf.mxu1 }
 0x1df   :  { %v1216_v50 = vadd.f32 %v1215_v48, %v1202_v49 }
 0x1ec   :  { %v1227_v45 = vpop.f32.mrf.mxu2 }
 0x1ed   :  { %v1228_v46 = vadd.f32 %v1227_v45, %v1214_v44 }
 0x1ef   :  { %1233 = vst.msk [vmem:[%s2030_s7] sm:$0xff] %vm1232_vm2, %v1228_v46 }
 0x1f4   :  { %v1229_v51 = vpop.f32.mrf.mxu2 }
 0x1f5   :  { %v1230_v52 = vadd.f32 %v1229_v51, %v1216_v50 }
 0x1f7   :  { %1234 = vst.msk [vmem:[%s2030_s7 + $0x8] sm:$0xff] %vm1232_vm2, %v1230_v52 }
 0x1f8   :  { %1239 = vsyncpa [#allocation3], 1 }
 0x1f9   :  { %1240 = vsyncpa [#allocation5], 1 }

</bundles_post_ra>
